<compile_context>
chip_gen: v7x
topology: tpu7x:2x2x1
jax: 0.10.0
libtpu: 0.0.40
codegen_flags: <defaults>
</compile_context>

<pallas_src>
import functools

import jax
import jax.numpy as jnp
from jax.experimental import pallas as pl
from jax.experimental.pallas import tpu as pltpu


# ------------------------------- fused kernel --------------------------------

def _ucell_fused_kernel(x0_ref, x1_ref, pre0_ref, pre1_ref, ew_ref, o_ref):
    """Whole UCellNSkip for one row-tile; all intermediate states stay on-chip.

    x0_ref:  (tm, C_prev_prev) bf16
    x1_ref:  (tm, C_prev)      bf16
    pre0_ref:(C_prev_prev, C)  bf16
    pre1_ref:(C_prev, C)       bf16
    ew_ref:  (8, C, C)         bf16   (node k, edge e -> ew_ref[2*k + e])
    o_ref:   (tm, 4*C)         bf16   (unpadded — no zero-lane write amplification)
    """

    def act(x):
        # 'htanh' activation; bf16 inputs stay bf16, f32 node states are clipped in f32
        # (their native accumulation dtype) and downcast once for the MXU.
        return jnp.clip(x, -1.0, 1.0).astype(jnp.bfloat16)

    def pw(a_bf16, w_bf16):
        # bf16 MXU matmul with f32 accumulation.
        return jnp.dot(a_bf16, w_bf16, preferred_element_type=jnp.float32)

    # preprocess0 / preprocess1 : activation + 1x1 channel-mixing conv.
    s0 = pw(act(x0_ref[...]), pre0_ref[...])       # (tm, C) f32
    s1 = pw(act(x1_ref[...]), pre1_ref[...])

    def node(k, h_a, h_b):
        # Two edges as two dots summed (EvalSum).  No lane-concat: at C % 128 != 0 a
        # stacked-K concat lowers to a cross-lane relayout, while the MXU has slack.
        return pw(act(h_a), ew_ref[2 * k]) + pw(act(h_b), ew_ref[2 * k + 1])

    # Stride-2 edges of the 'u' cell are evaluated at low resolution (the x2 nearest
    # upsample commutes with the pointwise ops and is applied after the cell).
    s2 = node(0, s0, s1)
    s3 = node(1, s1, s2)
    s4 = node(2, s2, s3)
    s5 = node(3, s3, s4)

    # EvalCat: store each node output directly into its column slice of the unpadded
    # output — no concatenated temporary, no pad-zero materialization.
    c = s2.shape[-1]
    for k, s in enumerate((s2, s3, s4, s5)):
        o_ref[:, k * c:(k + 1) * c] = s.astype(o_ref.dtype)


# ------------------------------- host wrappers --------------------------------

def _round_up(x, mult):
    return ((x + mult - 1) // mult) * mult


def _choose_tm(m, bytes_per_row, target=1024, min_grid=4,
               vmem_budget=28 * 1024 * 1024):
    """Row tile: multiple of 8, >= min_grid tiles (>=2 pipelined steps per v7x TC),
    target ~1024 rows to amortize per-step overhead on v5e/v6e, capped by a VMEM
    estimate that includes the f32 intermediates (safe on v7x's 64 MiB VMEM)."""
    tm = min(target, max(8, -(-m // min_grid)))
    tm = min(tm, max(8, vmem_budget // max(1, bytes_per_row)))
    return max(8, (tm // 8) * 8)


def ucell_nskip_fused_2d(x0_2d, x1_2d, pre0, pre1, edge_w, c):
    """Runs the whole cell (at low resolution) as a single pallas_call.

    x0_2d/x1_2d: (M, Cin) bf16 flattened NHWC pixels.  Returns (M, 4*c) bf16.
    """
    m, cpp = x0_2d.shape
    cprev = x1_2d.shape[1]
    cout = 4 * c

    # Per-row VMEM estimate: double-buffered bf16 inputs + output, plus f32 node states
    # and bf16 activation copies (rough upper bound).
    bytes_per_row = (2 * 2 * (cpp + cprev)      # inputs, bf16, double-buffered
                     + 2 * 2 * cout             # output, bf16, double-buffered
                     + 8 * 4 * c                # f32 states s0..s5 + temporaries
                     + 4 * 2 * c)               # bf16 activation copies
    tm = _choose_tm(m, bytes_per_row)
    m_pad = _round_up(m, tm)
    if m_pad != m:
        x0_2d = jnp.pad(x0_2d, ((0, m_pad - m), (0, 0)))
        x1_2d = jnp.pad(x1_2d, ((0, m_pad - m), (0, 0)))

    out = pl.pallas_call(
        _ucell_fused_kernel,
        out_shape=jax.ShapeDtypeStruct((m_pad, cout), jnp.bfloat16),
        grid_spec=pltpu.PrefetchScalarGridSpec(
            num_scalar_prefetch=0,
            grid=(m_pad // tm,),
            in_specs=[
                pl.BlockSpec((tm, cpp), lambda i: (i, 0)),
                pl.BlockSpec((tm, cprev), lambda i: (i, 0)),
                # Weights: constant block index -> DMA'd once, resident across steps.
                pl.BlockSpec((cpp, c), lambda i: (0, 0)),
                pl.BlockSpec((cprev, c), lambda i: (0, 0)),
                pl.BlockSpec((8, c, c), lambda i: (0, 0, 0)),
            ],
            out_specs=pl.BlockSpec((tm, cout), lambda i: (i, 0)),
        ),
        compiler_params=pltpu.CompilerParams(
            dimension_semantics=("parallel",),      # rows shard over v7x's 2 TCs
            vmem_limit_bytes=48 * 1024 * 1024,
        ),
    )(x0_2d, x1_2d, pre0, pre1, edge_w)
    return out[:m]


def init_params(key, C, C_prev_prev, C_prev, node_num=4, edges_num=2):
    ks = jax.random.split(key, 2 + node_num * edges_num)
    scale = 0.1
    edges = jnp.stack([scale * jax.random.normal(ks[2 + i], (C, C), jnp.float32)
                       for i in range(node_num * edges_num)], axis=0)
    # Pre-cast to bf16 ONCE on the host (halves weight DMA, no per-step cast in-kernel).
    return {
        "pre0": (scale * jax.random.normal(ks[0], (C_prev_prev, C), jnp.float32)
                 ).astype(jnp.bfloat16),
        "pre1": (scale * jax.random.normal(ks[1], (C_prev, C), jnp.float32)
                 ).astype(jnp.bfloat16),
        "edge_w": edges.astype(jnp.bfloat16),        # (node_num*edges_num, C, C)
    }


def ucell_nskip_forward(params, input0_nchw, input1_nchw, C, node_num=4,
                        nchw_output=True, out_dtype=jnp.float32):
    """Forward matching UCellNSkip.forward (NCHW in / NCHW out by default).

    Set nchw_output=False to keep the cell output NHWC and skip the final transpose
    (defers the layout change to the consumer — recommended when fusing with a next op).
    """
    assert node_num == 4, "fused kernel is specialized for node_num=4"
    n, cpp, h, w = input0_nchw.shape
    cprev = input1_nchw.shape[1]
    m = n * h * w

    # NCHW -> (N*H*W, Cin) in bf16: the bf16 cast fuses into the transpose pass that XLA
    # materializes anyway, halving the kernel's input HBM read.
    x0 = jnp.transpose(input0_nchw, (0, 2, 3, 1)).reshape(m, cpp).astype(jnp.bfloat16)
    x1 = jnp.transpose(input1_nchw, (0, 2, 3, 1)).reshape(m, cprev).astype(jnp.bfloat16)

    out2d = ucell_nskip_fused_2d(x0, x1, params["pre0"], params["pre1"],
                                 params["edge_w"], C)

    # Epilogue: nearest x2 upsample + (optional) NHWC->NCHW + dtype cast.  repeat/reshape/
    # transpose/convert are all simple ops, so XLA emits ONE copy fusion that reads the
    # minimal unpadded bf16 low-res slab and writes the final tensor — duplicating pixels
    # inside the kernel would only add HBM bytes since this pass exists regardless.
    out_low = out2d.reshape(n, h, w, node_num * C)
    out_up = jnp.repeat(jnp.repeat(out_low, 2, axis=1), 2, axis=2)   # (N, 2H, 2W, 4C)
    if nchw_output:
        out_up = jnp.transpose(out_up, (0, 3, 1, 2))                 # (N, 4C, 2H, 2W)
    return out_up.astype(out_dtype)


# ---------------------- pure-JAX reference (original op order) -------------------

def _reference_forward(params, input0_nchw, input1_nchw, C, node_num=4):
    """f32 reference in the ORIGINAL op order (upsample inside the stride-2 edges)."""
    def up2(x):
        return jnp.repeat(jnp.repeat(x, 2, axis=1), 2, axis=2)

    def pw(x, wmat):
        return jnp.einsum("nhwc,cd->nhwd", jnp.clip(x, -1.0, 1.0),
                          wmat.astype(jnp.float32))

    x0 = jnp.transpose(input0_nchw, (0, 2, 3, 1))
    x1 = jnp.transpose(input1_nchw, (0, 2, 3, 1))
    states = [pw(x0, params["pre0"]), pw(x1, params["pre1"])]
    for nd in range(node_num):
        wa = params["edge_w"][2 * nd]
        wb = params["edge_w"][2 * nd + 1]
        ha, hb = states[-2], states[-1]
        if nd + 0 <= 1:
            ha = up2(ha)
        if nd + 1 <= 1:
            hb = up2(hb)
        states.append(pw(ha, wa) + pw(hb, wb))
    out = jnp.concatenate(states[-node_num:], axis=-1)
    return jnp.transpose(out, (0, 3, 1, 2))


# ------------------------------------ main ------------------------------------

if __name__ == "__main__":
    key = jax.random.PRNGKey(0)
    N, C, H, W = 2, 4, 16, 16
    C_prev_prev, C_prev = 4, 4

    k0, k1, kp = jax.random.split(key, 3)
    input0 = jax.random.normal(k0, (N, C_prev_prev, H, W), jnp.float32)  # NCHW
    input1 = jax.random.normal(k1, (N, C_prev, H, W), jnp.float32)       # NCHW
    params = init_params(kp, C, C_prev_prev, C_prev)

    fwd = jax.jit(functools.partial(ucell_nskip_forward, C=C))
    out = jax.block_until_ready(fwd(params, input0, input1))

    assert out.shape == (N, 4 * C, 2 * H, 2 * W), out.shape
    assert bool(jnp.all(jnp.isfinite(out)))

    ref = _reference_forward(params, input0, input1, C)
    max_err = float(jnp.max(jnp.abs(out - ref)))
    assert max_err < 2e-2, f"max abs error vs reference: {max_err}"

    print("KERNEL_OK")
</pallas_src>

<mosaic_0001>
module attributes {stable_mosaic.version = 11 : i64} {
  func.func @_ucell_fused_kernel(%arg0: i32, %arg1: memref<128x4xbf16, #tpu.memory_space<vmem>>, %arg2: memref<128x4xbf16, #tpu.memory_space<vmem>>, %arg3: memref<4x4xbf16, #tpu.memory_space<vmem>>, %arg4: memref<4x4xbf16, #tpu.memory_space<vmem>>, %arg5: memref<8x4x4xbf16, #tpu.memory_space<vmem>>, %arg6: memref<128x16xbf16, #tpu.memory_space<vmem>>) attributes {dimension_semantics = [#tpu.dimension_semantics<parallel>], iteration_bounds = array<i64: 4>, scalar_prefetch = 0 : i64, scratch_operands = 0 : i64, tpu.core_type = #tpu.core_type<tc>, window_params = [{transform_indices = @transform_0, window_bounds = array<i64: 128, 4>}, {transform_indices = @transform_1, window_bounds = array<i64: 128, 4>}, {pipeline_mode = #tpu.pipeline_mode<synchronous>, transform_indices = @transform_2, window_bounds = array<i64: 4, 4>}, {pipeline_mode = #tpu.pipeline_mode<synchronous>, transform_indices = @transform_3, window_bounds = array<i64: 4, 4>}, {pipeline_mode = #tpu.pipeline_mode<synchronous>, transform_indices = @transform_4, window_bounds = array<i64: 8, 4, 4>}, {transform_indices = @transform_5, window_bounds = array<i64: 128, 16>}]} {
    %c0 = arith.constant 0 : index
    %c0_0 = arith.constant 0 : index
    %0 = vector.load %arg1[%c0, %c0_0] : memref<128x4xbf16, #tpu.memory_space<vmem>>, vector<128x4xbf16>
    %cst = arith.constant -1.000000e+00 : f32
    %cst_1 = arith.constant 1.000000e+00 : f32
    %1 = arith.truncf %cst : f32 to bf16
    %2 = vector.broadcast %1 : bf16 to vector<128x4xbf16>
    %3 = arith.maximumf %2, %0 : vector<128x4xbf16>
    %4 = arith.truncf %cst_1 : f32 to bf16
    %5 = vector.broadcast %4 : bf16 to vector<128x4xbf16>
    %6 = arith.minimumf %5, %3 : vector<128x4xbf16>
    %c0_2 = arith.constant 0 : index
    %c0_3 = arith.constant 0 : index
    %7 = vector.load %arg3[%c0_2, %c0_3] : memref<4x4xbf16, #tpu.memory_space<vmem>>, vector<4x4xbf16>
    %cst_4 = arith.constant dense<0.000000e+00> : vector<128x4xf32>
    %8 = tpu.matmul %6, %7, %cst_4 {dimension_numbers = #tpu.dot_dimension_numbers<[1], [0], [0], [1], [0, 0, 1, 1], [], []>} : vector<128x4xbf16>, vector<4x4xbf16>, vector<128x4xf32> -> vector<128x4xf32>
    %c0_5 = arith.constant 0 : index
    %c0_6 = arith.constant 0 : index
    %9 = vector.load %arg2[%c0_5, %c0_6] : memref<128x4xbf16, #tpu.memory_space<vmem>>, vector<128x4xbf16>
    %cst_7 = arith.constant -1.000000e+00 : f32
    %cst_8 = arith.constant 1.000000e+00 : f32
    %10 = arith.truncf %cst_7 : f32 to bf16
    %11 = vector.broadcast %10 : bf16 to vector<128x4xbf16>
    %12 = arith.maximumf %11, %9 : vector<128x4xbf16>
    %13 = arith.truncf %cst_8 : f32 to bf16
    %14 = vector.broadcast %13 : bf16 to vector<128x4xbf16>
    %15 = arith.minimumf %14, %12 : vector<128x4xbf16>
    %c0_9 = arith.constant 0 : index
    %c0_10 = arith.constant 0 : index
    %16 = vector.load %arg4[%c0_9, %c0_10] : memref<4x4xbf16, #tpu.memory_space<vmem>>, vector<4x4xbf16>
    %cst_11 = arith.constant dense<0.000000e+00> : vector<128x4xf32>
    %17 = tpu.matmul %15, %16, %cst_11 {dimension_numbers = #tpu.dot_dimension_numbers<[1], [0], [0], [1], [0, 0, 1, 1], [], []>} : vector<128x4xbf16>, vector<4x4xbf16>, vector<128x4xf32> -> vector<128x4xf32>
    %cst_12 = arith.constant -1.000000e+00 : f32
    %cst_13 = arith.constant 1.000000e+00 : f32
    %18 = vector.broadcast %cst_12 : f32 to vector<128x4xf32>
    %19 = arith.maximumf %18, %8 : vector<128x4xf32>
    %20 = vector.broadcast %cst_13 : f32 to vector<128x4xf32>
    %21 = arith.minimumf %20, %19 : vector<128x4xf32>
    %22 = arith.truncf %21 : vector<128x4xf32> to vector<128x4xbf16>
    %c0_14 = arith.constant 0 : index
    %c0_15 = arith.constant 0 : index
    %c0_16 = arith.constant 0 : index
    %23 = vector.load %arg5[%c0_14, %c0_15, %c0_16] : memref<8x4x4xbf16, #tpu.memory_space<vmem>>, vector<1x4x4xbf16>
    %24 = vector.shape_cast %23 : vector<1x4x4xbf16> to vector<4x4xbf16>
    %cst_17 = arith.constant dense<0.000000e+00> : vector<128x4xf32>
    %25 = tpu.matmul %22, %24, %cst_17 {dimension_numbers = #tpu.dot_dimension_numbers<[1], [0], [0], [1], [0, 0, 1, 1], [], []>} : vector<128x4xbf16>, vector<4x4xbf16>, vector<128x4xf32> -> vector<128x4xf32>
    %cst_18 = arith.constant -1.000000e+00 : f32
    %cst_19 = arith.constant 1.000000e+00 : f32
    %26 = vector.broadcast %cst_18 : f32 to vector<128x4xf32>
    %27 = arith.maximumf %26, %17 : vector<128x4xf32>
    %28 = vector.broadcast %cst_19 : f32 to vector<128x4xf32>
    %29 = arith.minimumf %28, %27 : vector<128x4xf32>
    %30 = arith.truncf %29 : vector<128x4xf32> to vector<128x4xbf16>
    %c1 = arith.constant 1 : index
    %c0_20 = arith.constant 0 : index
    %c0_21 = arith.constant 0 : index
    %31 = vector.load %arg5[%c1, %c0_20, %c0_21] : memref<8x4x4xbf16, #tpu.memory_space<vmem>>, vector<1x4x4xbf16>
    %32 = vector.shape_cast %31 : vector<1x4x4xbf16> to vector<4x4xbf16>
    %cst_22 = arith.constant dense<0.000000e+00> : vector<128x4xf32>
    %33 = tpu.matmul %30, %32, %cst_22 {dimension_numbers = #tpu.dot_dimension_numbers<[1], [0], [0], [1], [0, 0, 1, 1], [], []>} : vector<128x4xbf16>, vector<4x4xbf16>, vector<128x4xf32> -> vector<128x4xf32>
    %34 = arith.addf %25, %33 : vector<128x4xf32>
    %cst_23 = arith.constant -1.000000e+00 : f32
    %cst_24 = arith.constant 1.000000e+00 : f32
    %35 = vector.broadcast %cst_23 : f32 to vector<128x4xf32>
    %36 = arith.maximumf %35, %17 : vector<128x4xf32>
    %37 = vector.broadcast %cst_24 : f32 to vector<128x4xf32>
    %38 = arith.minimumf %37, %36 : vector<128x4xf32>
    %39 = arith.truncf %38 : vector<128x4xf32> to vector<128x4xbf16>
    %c2 = arith.constant 2 : index
    %c0_25 = arith.constant 0 : index
    %c0_26 = arith.constant 0 : index
    %40 = vector.load %arg5[%c2, %c0_25, %c0_26] : memref<8x4x4xbf16, #tpu.memory_space<vmem>>, vector<1x4x4xbf16>
    %41 = vector.shape_cast %40 : vector<1x4x4xbf16> to vector<4x4xbf16>
    %cst_27 = arith.constant dense<0.000000e+00> : vector<128x4xf32>
    %42 = tpu.matmul %39, %41, %cst_27 {dimension_numbers = #tpu.dot_dimension_numbers<[1], [0], [0], [1], [0, 0, 1, 1], [], []>} : vector<128x4xbf16>, vector<4x4xbf16>, vector<128x4xf32> -> vector<128x4xf32>
    %cst_28 = arith.constant -1.000000e+00 : f32
    %cst_29 = arith.constant 1.000000e+00 : f32
    %43 = vector.broadcast %cst_28 : f32 to vector<128x4xf32>
    %44 = arith.maximumf %43, %34 : vector<128x4xf32>
    %45 = vector.broadcast %cst_29 : f32 to vector<128x4xf32>
    %46 = arith.minimumf %45, %44 : vector<128x4xf32>
    %47 = arith.truncf %46 : vector<128x4xf32> to vector<128x4xbf16>
    %c3 = arith.constant 3 : index
    %c0_30 = arith.constant 0 : index
    %c0_31 = arith.constant 0 : index
    %48 = vector.load %arg5[%c3, %c0_30, %c0_31] : memref<8x4x4xbf16, #tpu.memory_space<vmem>>, vector<1x4x4xbf16>
    %49 = vector.shape_cast %48 : vector<1x4x4xbf16> to vector<4x4xbf16>
    %cst_32 = arith.constant dense<0.000000e+00> : vector<128x4xf32>
    %50 = tpu.matmul %47, %49, %cst_32 {dimension_numbers = #tpu.dot_dimension_numbers<[1], [0], [0], [1], [0, 0, 1, 1], [], []>} : vector<128x4xbf16>, vector<4x4xbf16>, vector<128x4xf32> -> vector<128x4xf32>
    %51 = arith.addf %42, %50 : vector<128x4xf32>
    %cst_33 = arith.constant -1.000000e+00 : f32
    %cst_34 = arith.constant 1.000000e+00 : f32
    %52 = vector.broadcast %cst_33 : f32 to vector<128x4xf32>
    %53 = arith.maximumf %52, %34 : vector<128x4xf32>
    %54 = vector.broadcast %cst_34 : f32 to vector<128x4xf32>
    %55 = arith.minimumf %54, %53 : vector<128x4xf32>
    %56 = arith.truncf %55 : vector<128x4xf32> to vector<128x4xbf16>
    %c4 = arith.constant 4 : index
    %c0_35 = arith.constant 0 : index
    %c0_36 = arith.constant 0 : index
    %57 = vector.load %arg5[%c4, %c0_35, %c0_36] : memref<8x4x4xbf16, #tpu.memory_space<vmem>>, vector<1x4x4xbf16>
    %58 = vector.shape_cast %57 : vector<1x4x4xbf16> to vector<4x4xbf16>
    %cst_37 = arith.constant dense<0.000000e+00> : vector<128x4xf32>
    %59 = tpu.matmul %56, %58, %cst_37 {dimension_numbers = #tpu.dot_dimension_numbers<[1], [0], [0], [1], [0, 0, 1, 1], [], []>} : vector<128x4xbf16>, vector<4x4xbf16>, vector<128x4xf32> -> vector<128x4xf32>
    %cst_38 = arith.constant -1.000000e+00 : f32
    %cst_39 = arith.constant 1.000000e+00 : f32
    %60 = vector.broadcast %cst_38 : f32 to vector<128x4xf32>
    %61 = arith.maximumf %60, %51 : vector<128x4xf32>
    %62 = vector.broadcast %cst_39 : f32 to vector<128x4xf32>
    %63 = arith.minimumf %62, %61 : vector<128x4xf32>
    %64 = arith.truncf %63 : vector<128x4xf32> to vector<128x4xbf16>
    %c5 = arith.constant 5 : index
    %c0_40 = arith.constant 0 : index
    %c0_41 = arith.constant 0 : index
    %65 = vector.load %arg5[%c5, %c0_40, %c0_41] : memref<8x4x4xbf16, #tpu.memory_space<vmem>>, vector<1x4x4xbf16>
    %66 = vector.shape_cast %65 : vector<1x4x4xbf16> to vector<4x4xbf16>
    %cst_42 = arith.constant dense<0.000000e+00> : vector<128x4xf32>
    %67 = tpu.matmul %64, %66, %cst_42 {dimension_numbers = #tpu.dot_dimension_numbers<[1], [0], [0], [1], [0, 0, 1, 1], [], []>} : vector<128x4xbf16>, vector<4x4xbf16>, vector<128x4xf32> -> vector<128x4xf32>
    %68 = arith.addf %59, %67 : vector<128x4xf32>
    %cst_43 = arith.constant -1.000000e+00 : f32
    %cst_44 = arith.constant 1.000000e+00 : f32
    %69 = vector.broadcast %cst_43 : f32 to vector<128x4xf32>
    %70 = arith.maximumf %69, %51 : vector<128x4xf32>
    %71 = vector.broadcast %cst_44 : f32 to vector<128x4xf32>
    %72 = arith.minimumf %71, %70 : vector<128x4xf32>
    %73 = arith.truncf %72 : vector<128x4xf32> to vector<128x4xbf16>
    %c6 = arith.constant 6 : index
    %c0_45 = arith.constant 0 : index
    %c0_46 = arith.constant 0 : index
    %74 = vector.load %arg5[%c6, %c0_45, %c0_46] : memref<8x4x4xbf16, #tpu.memory_space<vmem>>, vector<1x4x4xbf16>
    %75 = vector.shape_cast %74 : vector<1x4x4xbf16> to vector<4x4xbf16>
    %cst_47 = arith.constant dense<0.000000e+00> : vector<128x4xf32>
    %76 = tpu.matmul %73, %75, %cst_47 {dimension_numbers = #tpu.dot_dimension_numbers<[1], [0], [0], [1], [0, 0, 1, 1], [], []>} : vector<128x4xbf16>, vector<4x4xbf16>, vector<128x4xf32> -> vector<128x4xf32>
    %cst_48 = arith.constant -1.000000e+00 : f32
    %cst_49 = arith.constant 1.000000e+00 : f32
    %77 = vector.broadcast %cst_48 : f32 to vector<128x4xf32>
    %78 = arith.maximumf %77, %68 : vector<128x4xf32>
    %79 = vector.broadcast %cst_49 : f32 to vector<128x4xf32>
    %80 = arith.minimumf %79, %78 : vector<128x4xf32>
    %81 = arith.truncf %80 : vector<128x4xf32> to vector<128x4xbf16>
    %c7 = arith.constant 7 : index
    %c0_50 = arith.constant 0 : index
    %c0_51 = arith.constant 0 : index
    %82 = vector.load %arg5[%c7, %c0_50, %c0_51] : memref<8x4x4xbf16, #tpu.memory_space<vmem>>, vector<1x4x4xbf16>
    %83 = vector.shape_cast %82 : vector<1x4x4xbf16> to vector<4x4xbf16>
    %cst_52 = arith.constant dense<0.000000e+00> : vector<128x4xf32>
    %84 = tpu.matmul %81, %83, %cst_52 {dimension_numbers = #tpu.dot_dimension_numbers<[1], [0], [0], [1], [0, 0, 1, 1], [], []>} : vector<128x4xbf16>, vector<4x4xbf16>, vector<128x4xf32> -> vector<128x4xf32>
    %85 = arith.addf %76, %84 : vector<128x4xf32>
    %86 = arith.truncf %34 : vector<128x4xf32> to vector<128x4xbf16>
    %c0_53 = arith.constant 0 : index
    %c0_54 = arith.constant 0 : index
    %87 = vector.load %arg6[%c0_53, %c0_54] : memref<128x16xbf16, #tpu.memory_space<vmem>>, vector<128x4xbf16>
    tpu.vector_store %arg6[%c0_53, %c0_54], %86 {strides = array<i32>} : memref<128x16xbf16, #tpu.memory_space<vmem>>, vector<128x4xbf16>,
    %88 = arith.truncf %51 : vector<128x4xf32> to vector<128x4xbf16>
    %c0_55 = arith.constant 0 : index
    %c4_56 = arith.constant 4 : index
    %89 = vector.load %arg6[%c0_55, %c4_56] : memref<128x16xbf16, #tpu.memory_space<vmem>>, vector<128x4xbf16>
    tpu.vector_store %arg6[%c0_55, %c4_56], %88 {strides = array<i32>} : memref<128x16xbf16, #tpu.memory_space<vmem>>, vector<128x4xbf16>,
    %90 = arith.truncf %68 : vector<128x4xf32> to vector<128x4xbf16>
    %c0_57 = arith.constant 0 : index
    %c8 = arith.constant 8 : index
    %91 = vector.load %arg6[%c0_57, %c8] : memref<128x16xbf16, #tpu.memory_space<vmem>>, vector<128x4xbf16>
    tpu.vector_store %arg6[%c0_57, %c8], %90 {strides = array<i32>} : memref<128x16xbf16, #tpu.memory_space<vmem>>, vector<128x4xbf16>,
    %92 = arith.truncf %85 : vector<128x4xf32> to vector<128x4xbf16>
    %c0_58 = arith.constant 0 : index
    %c12 = arith.constant 12 : index
    %93 = vector.load %arg6[%c0_58, %c12] : memref<128x16xbf16, #tpu.memory_space<vmem>>, vector<128x4xbf16>
    tpu.vector_store %arg6[%c0_58, %c12], %92 {strides = array<i32>} : memref<128x16xbf16, #tpu.memory_space<vmem>>, vector<128x4xbf16>,
    return
  }
  func.func @transform_0(%arg0: i32) -> (i32, i32) {
    %c0_i32 = arith.constant 0 : i32
    %c0_i32_0 = arith.constant 0 : i32
    return %arg0, %c0_i32 : i32, i32
  }
  func.func @transform_1(%arg0: i32) -> (i32, i32) {
    %c0_i32 = arith.constant 0 : i32
    %c0_i32_0 = arith.constant 0 : i32
    return %arg0, %c0_i32 : i32, i32
  }
  func.func @transform_2(%arg0: i32) -> (i32, i32) {
    %c0_i32 = arith.constant 0 : i32
    %c0_i32_0 = arith.constant 0 : i32
    %c0_i32_1 = arith.constant 0 : i32
    return %c0_i32, %c0_i32_0 : i32, i32
  }
  func.func @transform_3(%arg0: i32) -> (i32, i32) {
    %c0_i32 = arith.constant 0 : i32
    %c0_i32_0 = arith.constant 0 : i32
    %c0_i32_1 = arith.constant 0 : i32
    return %c0_i32, %c0_i32_0 : i32, i32
  }
  func.func @transform_4(%arg0: i32) -> (i32, i32, i32) {
    %c0_i32 = arith.constant 0 : i32
    %c0_i32_0 = arith.constant 0 : i32
    %c0_i32_1 = arith.constant 0 : i32
    %c0_i32_2 = arith.constant 0 : i32
    return %c0_i32, %c0_i32_0, %c0_i32_1 : i32, i32, i32
  }
  func.func @transform_5(%arg0: i32) -> (i32, i32) {
    %c0_i32 = arith.constant 0 : i32
    %c0_i32_0 = arith.constant 0 : i32
    return %arg0, %c0_i32 : i32, i32
  }
}

</mosaic_0001>

<bundles_post_ra>
// kernel: ucell_nskip_forward.1
= control target key start
LH: loop header
LB: loop body
LE: loop exit
PB: predicated region body
PF: predicated region fallthrough
CT: control target
= control target key end

     0   :  { %s3056_s18 = smov 0   ;;  %s3521_s0 = inlined_call_operand.vmem [shape: bf16[512,4], index: 0, kind: input, shape index: {}]   ;;  %s3522_s1 = inlined_call_operand.vmem [shape: bf16[512,4], index: 1, kind: input, shape index: {}]   ;;  %s3523_s2 = inlined_call_operand.vmem [shape: bf16[4,4], index: 2, kind: input, shape index: {}]   ;;  %s3524_s3 = inlined_call_operand.vmem [shape: bf16[4,4], index: 3, kind: input, shape index: {}]   ;;  %s3525_s4 = inlined_call_operand.vmem [shape: bf16[8,4,4], index: 4, kind: input, shape index: {}]   ;;  %s3526_s5 = inlined_call_operand.vmem [shape: bf16[512,16], index: 5, kind: output, shape index: {}]  }
   0x1 LB: > { %s2304_s19 = sadd.s32 4294967295, %s3021_s18   ;;  %p2308_p0 = scmp.ge.s32.totalorder %s3021_s18, 1  ;;  %s3021_s18 = sphi %s3056_s18, %s15_s18  }
   0x2   : > { %p199_p1 = scmp.lt.s32.totalorder %s3021_s18, 5 }
   0x4   : > { %p200_p2 = pnand %p2308_p0, %p199_p1 }
   0x5   : > { %vm367_vm0 = vcmask (!%p200_p2), 1041408   ;;  %v516_v0 = vld [vmem:[%s3524_s3] sm:$0x3] (!%p200_p2)  ;;  %s2309_s22 = sshll.u32 (!%p200_p2), %s2304_s19, 4  ;;  %v2411_v3 = vld [vmem:[%s3525_s4 + $0x2] sm:$0x3] (!%p200_p2) }
   0x6   : > { %203 = sbr.rel (%p200_p2) target bundleno = 1391 (0x56f), region = 40  ;;  %2995 = vmatprep.subr.msk.bf16.mxu1 (!%p200_p2), %vm367_vm0, %v516_v0  ;;  %v582_v1 = vsel (!%p200_p2), %vm367_vm0, %v516_v0, 0  ;;  %p233_p3 = scmp.lt.s32.totalorder (!%p200_p2), %s2309_s22, 63  ;;  %v301_v2 = vld [vmem:[%s3523_s2] sm:$0x3] (!%p200_p2)  ;;  %vm342_vm1 = vcmask (!%p200_p2), 31744  }
   0x7   : > { %2769 = vmatpush3.bf16.msra.mxu1 (!%p200_p2), %v582_v1  ;;  %2994 = vmatprep.subr.msk.bf16.mxu0 (!%p200_p2), %vm367_vm0, %v301_v2  ;;  %v369_v4 = vsel (!%p200_p2), %vm367_vm0, %v301_v2, 0  ;;  %v789_v33 = vsel (!%p200_p2), %vm367_vm0, %v2411_v3, 0  ;;  %vm1880_vm2 = vcmask (!%p200_p2), 27648   ;;  %s3023_s23 = smov (!%p200_p2), 4   ;;  %vm1993_vm3 = vcmask (!%p200_p2), 60448   ;;  %s3024_s28 = smov (!%p200_p2), 8  }
   0x8   : > { %2751 = vmatpush3.bf16.msra.mxu0 (!%p200_p2), %v369_v4  ;;  %vm2106_vm4 = vcmask (!%p200_p2), 93248   ;;  %s3025_s29 = smov (!%p200_p2), 12   ;;  %vm2219_vm5 = vcmask (!%p200_p2), 126048  }
   0x9   : > { %2996 = vmatprep.subr.msk.bf16.mxu0 (!%p200_p2), %vm367_vm0, %v2411_v3 }
   0xd   : > { %s3528_s22 = smov (!%p233_p3, %s2309_s22), 63 }
   0xe   : > { %s3078_s27 = sshll.u32 %s3528_s22, 2 }
   0xf   : > { %s3084_s30 = scalar_lea.vmem %s3522_s1, %s3078_s27  ;;  %s3105_s8 = scalar_lea.vmem %s3521_s0, %s3078_s27 }
  0x10   : > { %v468_v5 = vld [vmem:[%s3084_s30] sm:$0xf]  ;;  %v469_v6 = vld [vmem:[%s3084_s30 + $0x4] sm:$0xf]  ;;  %v470_v7 = vld [vmem:[%s3084_s30 + $0x8] sm:$0xf]  ;;  %s3204_s20 = scalar_lea.vmem %s3526_s5, %s3078_s27 }
  0x11   : > { %v2347_v8 = vclamps-bf16 %v468_v5, 1, 1  ;;  %v2348_v9 = vclamps-bf16 %v469_v6, 1, 1  ;;  %v471_v10 = vld [vmem:[%s3084_s30 + $0xc] sm:$0xf] }
  0x12   : > { %v2349_v11 = vclamps-bf16 %v470_v7, 1, 1  ;;  %v2350_v12 = vclamps-bf16 %v471_v10, 1, 1  ;;  %v472_v13 = vld [vmem:[%s3084_s30 + $0x10] sm:$0xf] }
  0x13   : > { %v2363_v14 = vcombine.low %v2347_v8, %v2348_v9  ;;  %v473_v15 = vld [vmem:[%s3084_s30 + $0x14] sm:$0xf]  ;;  %v2351_v16 = vclamps-bf16 %v472_v13, 1, 1  ;;  %v474_v17 = vld [vmem:[%s3084_s30 + $0x18] sm:$0xf] }
  0x14   : > { %v2364_v18 = vcombine.low %v2349_v11, %v2350_v12  ;;  %v2352_v19 = vclamps-bf16 %v473_v15, 1, 1  ;;  %v475_v20 = vld [vmem:[%s3084_s30 + $0x1c] sm:$0xf]  ;;  %v2353_v21 = vclamps-bf16 %v474_v17, 1, 1 }
  0x15   : > { %2770 = vmatprep.mubr.msk.bf16.mxu1 %vm342_vm1, %v2363_v14  ;;  %v476_v22 = vld [vmem:[%s3084_s30 + $0x20] sm:$0xf]  ;;  %v477_v23 = vld [vmem:[%s3084_s30 + $0x24] sm:$0xf]  ;;  %v2354_v25 = vclamps-bf16 %v475_v20, 1, 1 }
  0x16   : > { %2771 = vmatmul.mubr.msk.bf16.vlgmr.msra.gmra.mrb[0].mxu1 %vm342_vm1, %v2364_v18  ;;  %v2365_v24 = vcombine.low %v2351_v16, %v2352_v19  ;;  %v2355_v26 = vclamps-bf16 %v476_v22, 1, 1  ;;  %v478_v27 = vld [vmem:[%s3084_s30 + $0x28] sm:$0xf]  ;;  %v2356_v28 = vclamps-bf16 %v477_v23, 1, 1 }
  0x17   : > { %v479_v29 = vld [vmem:[%s3084_s30 + $0x2c] sm:$0xf]  ;;  %v480_v30 = vld [vmem:[%s3084_s30 + $0x30] sm:$0xf]  ;;  %v2357_v31 = vclamps-bf16 %v478_v27, 1, 1  ;;  %v2366_v34 = vcombine.low %v2353_v21, %v2354_v25 }
  0x18   : > { %2774 = vmatprep.mubr.msk.bf16.mxu1 %vm342_vm1, %v2365_v24  ;;  %v2358_v32 = vclamps-bf16 %v479_v29, 1, 1  ;;  %v481_v35 = vld [vmem:[%s3084_s30 + $0x34] sm:$0xf]  ;;  %v2359_v36 = vclamps-bf16 %v480_v30, 1, 1  ;;  %v2367_v38 = vcombine.low %v2355_v26, %v2356_v28 }
  0x19   : > { %v253_v37 = vld [vmem:[%s3105_s8] sm:$0xf]  ;;  %v254_v39 = vld [vmem:[%s3105_s8 + $0x4] sm:$0xf]  ;;  %v255_v41 = vld [vmem:[%s3105_s8 + $0x8] sm:$0xf] }
  0x1a   : > { %v2315_v40 = vclamps-bf16 %v253_v37, 1, 1  ;;  %v2316_v42 = vclamps-bf16 %v254_v39, 1, 1  ;;  %v256_v43 = vld [vmem:[%s3105_s8 + $0xc] sm:$0xf]  ;;  %v2368_v60 = vcombine.low %v2357_v31, %v2358_v32 }
  0x1b   : > { %v2317_v44 = vclamps-bf16 %v255_v41, 1, 1  ;;  %v2318_v45 = vclamps-bf16 %v256_v43, 1, 1  ;;  %v257_v46 = vld [vmem:[%s3105_s8 + $0x10] sm:$0xf] }
  0x1c   : > { %v258_v47 = vld [vmem:[%s3105_s8 + $0x14] sm:$0xf]  ;;  %v2331_v48 = vcombine.low %v2315_v40, %v2316_v42  ;;  %v2319_v49 = vclamps-bf16 %v257_v46, 1, 1  ;;  %v259_v51 = vld [vmem:[%s3105_s8 + $0x18] sm:$0xf] }
  0x1d   : > { %v2320_v50 = vclamps-bf16 %v258_v47, 1, 1  ;;  %v2360_v52 = vclamps-bf16 %v481_v35, 1, 1  ;;  %v2332_v53 = vcombine.low %v2317_v44, %v2318_v45  ;;  %v260_v54 = vld [vmem:[%s3105_s8 + $0x1c] sm:$0xf] }
  0x1e   : > { %2775 = vmatmul.mubr.msk.bf16.gmra.mrb[4].mxu1 %vm342_vm1, %v2366_v34  ;;  %v261_v55 = vld [vmem:[%s3105_s8 + $0x20] sm:$0xf]  ;;  %2752 = vmatprep.mubr.msk.bf16.mxu0 %vm342_vm1, %v2331_v48  ;;  %v262_v57 = vld [vmem:[%s3105_s8 + $0x24] sm:$0xf]  ;;  %v2321_v58 = vclamps-bf16 %v259_v51, 1, 1 }
  0x1f   : > { %2778 = vmatprep.mubr.msk.bf16.mxu1 %vm342_vm1, %v2367_v38  ;;  %v2333_v56 = vcombine.low %v2319_v49, %v2320_v50  ;;  %2753 = vmatmul.mubr.msk.bf16.vlgmr.msra.gmra.mrb[0].mxu0 %vm342_vm1, %v2332_v53  ;;  %v2322_v59 = vclamps-bf16 %v260_v54, 1, 1  ;;  %v482_v61 = vld [vmem:[%s3084_s30 + $0x38] sm:$0xf]  ;;  %v2323_v62 = vclamps-bf16 %v261_v55, 1, 1  ;;  %v2369_v0 = vcombine.low %v2359_v36, %v2360_v52 }
  0x20   : > { %v2324_v63 = vclamps-bf16 %v262_v57, 1, 1  ;;  %2787 = vmatpush3.bf16.msra.mxu0 %v789_v33  ;;  %v483_v1 = vld [vmem:[%s3084_s30 + $0x3c] sm:$0xf]  ;;  %v2361_v2 = vclamps-bf16 %v482_v61, 1, 1 }
  0x21   : > { %2756 = vmatprep.mubr.msk.bf16.mxu0 %vm342_vm1, %v2333_v56  ;;  %v2334_v3 = vcombine.low %v2321_v58, %v2322_v59  ;;  %v2362_v4 = vclamps-bf16 %v483_v1, 1, 1  ;;  %v263_v6 = vld [vmem:[%s3105_s8 + $0x28] sm:$0xf]  ;;  %v264_v7 = vld [vmem:[%s3105_s8 + $0x2c] sm:$0xf] }
  0x22   : > { %v2335_v5 = vcombine.low %v2323_v62, %v2324_v63  ;;  %v265_v8 = vld [vmem:[%s3105_s8 + $0x30] sm:$0xf]  ;;  %v266_v9 = vld [vmem:[%s3105_s8 + $0x34] sm:$0xf]  ;;  %v2325_v10 = vclamps-bf16 %v263_v6, 1, 1 }
  0x23   : > { %v2326_v11 = vclamps-bf16 %v264_v7, 1, 1  ;;  %v2370_v12 = vcombine.low %v2361_v2, %v2362_v4  ;;  %v2327_v13 = vclamps-bf16 %v265_v8, 1, 1  ;;  %v2328_v14 = vclamps-bf16 %v266_v9, 1, 1 }
  0x24   : > { %v267_v17 = vld [vmem:[%s3105_s8 + $0x38] sm:$0xf]  ;;  %v268_v18 = vld [vmem:[%s3105_s8 + $0x3c] sm:$0xf]  ;;  %v721_v22 = vld [vmem:[%s3525_s4] sm:$0x3] }
  0x25   : > { %v2336_v15 = vcombine.low %v2325_v10, %v2326_v11  ;;  %v2337_v16 = vcombine.low %v2327_v13, %v2328_v14  ;;  %v2329_v19 = vclamps-bf16 %v267_v17, 1, 1  ;;  %v2330_v20 = vclamps-bf16 %v268_v18, 1, 1  ;;  %2997 = vmatprep.subr.msk.bf16.mxu0 %vm367_vm0, %v721_v22  ;;  %v2445_v23 = vld [vmem:[%s3525_s4 + $0x6] sm:$0x3] }
  0x26   : > { %2779 = vmatmul.mubr.msk.bf16.gmra.mrb[8].mxu1 %vm342_vm1, %v2368_v60  ;;  %2998 = vmatprep.subr.msk.bf16.mxu1 %vm367_vm0, %v2445_v23  ;;  %v1081_v24 = vsel %vm367_vm0, %v2445_v23, 0  ;;  %v913_v35 = vsel %vm367_vm0, %v721_v22, 0 }
  0x27   : > { %2782 = vmatprep.mubr.msk.bf16.mxu1 %vm342_vm1, %v2369_v0  ;;  %2757 = vmatmul.mubr.msk.bf16.gmra.mrb[4].mxu0 %vm342_vm1, %v2334_v3  ;;  %v2338_v21 = vcombine.low %v2329_v19, %v2330_v20 }
  0x28   : > { %2760 = vmatprep.mubr.msk.bf16.mxu0 %vm342_vm1, %v2335_v5  ;;  %2823 = vmatpush3.bf16.msra.mxu1 %v1081_v24 }
  0x2e   : > { %2783 = vmatmul.mubr.msk.bf16.gmra.mrb[12].mxu1 %vm342_vm1, %v2370_v12 }
  0x2f   : > { %2761 = vmatmul.mubr.msk.bf16.gmra.mrb[8].mxu0 %vm342_vm1, %v2336_v15 }
  0x30   : > { %2764 = vmatprep.mubr.msk.bf16.mxu0 %vm342_vm1, %v2337_v16 }
  0x37   : > { %2765 = vmatmul.mubr.msk.bf16.gmra.mrb[12].mxu0 %vm342_vm1, %v2338_v21 }
  0xe9   : > { %v2772_v25 = vpop.f32.mrb[0].mxu1 }
  0xea   : > { %v618_v26 = vpop.f32.mrb[1].mxu1  ;;  %v2397_v28 = vclamps-f32 %v2772_v25, 1.0 }
  0xeb   : > { %v2773_v27 = vpop.f32.mrb[2].mxu1  ;;  %v2395_v31 = vclamps-f32 %v618_v26, 1.0 }
  0xec   : > { %v2398_v29 = vclamps-f32 %v2773_v27, 1.0  ;;  %v621_v30 = vpop.f32.mrb[3].mxu1 }
  0xed   : > { %v2396_v32 = vclamps-f32 %v621_v30, 1.0 }
  0xee   : > { %v3150_v33 = vpack.c.bf16 %v2398_v29, %v2397_v28 }
  0xef   : > { %v3152_v34 = vpack.c.bf16 %v2396_v32, %v2395_v31 }
  0xf1   : > { %v2776_v36 = vpop.f32.mrb[4].mxu1  ;;  %2788 = vmatprep.mubr.msk.bf16.mxu0 %vm342_vm1, %v3152_v34 }
  0xf2   : > { %v634_v37 = vpop.f32.mrb[5].mxu1  ;;  %2789 = vmatmul.mubr.msk.bf16.vlgmr.msra.gmra.mrb[16].mxu0 %vm342_vm1, %v3150_v33  ;;  %v2401_v39 = vclamps-f32 %v2776_v36, 1.0  ;;  %v2754_v42 = vpop.f32.mrb[0].mxu0 }
  0xf3   : > { %2805 = vmatpush3.bf16.msra.mxu0 %v913_v35  ;;  %v2777_v38 = vpop.f32.mrb[6].mxu1  ;;  %v2399_v43 = vclamps-f32 %v634_v37, 1.0  ;;  %v2381_v45 = vclamps-f32 %v2754_v42, 1.0  ;;  %v405_v46 = vpop.f32.mrb[1].mxu0 }
  0xf4   : > { %v2402_v40 = vclamps-f32 %v2777_v38, 1.0  ;;  %v637_v41 = vpop.f32.mrb[7].mxu1  ;;  %v2379_v48 = vclamps-f32 %v405_v46, 1.0  ;;  %v2755_v49 = vpop.f32.mrb[2].mxu0 }
  0xf5   : > { %v2400_v44 = vclamps-f32 %v637_v41, 1.0  ;;  %v2382_v51 = vclamps-f32 %v2755_v49, 1.0  ;;  %v408_v52 = vpop.f32.mrb[3].mxu0 }
  0xf6   : > { %v3159_v47 = vpack.c.bf16 %v2402_v40, %v2401_v39  ;;  %v2380_v53 = vclamps-f32 %v408_v52, 1.0 }
  0xf7   : > { %v3161_v50 = vpack.c.bf16 %v2400_v44, %v2399_v43  ;;  %v714_v55 = vpack.c.bf16 %v2382_v51, %v2381_v45  ;;  %v2428_v44 = vld [vmem:[%s3525_s4 + $0x4] sm:$0x3]  ;;  %v2479_v45 = vld [vmem:[%s3525_s4 + $0xa] sm:$0x3] }
  0xf8   : > { %v713_v57 = vpack.c.bf16 %v2380_v53, %v2379_v48  ;;  %2999 = vmatprep.subr.msk.bf16.mxu1 %vm367_vm0, %v2428_v44  ;;  %3000 = vmatprep.subr.msk.bf16.mxu0 %vm367_vm0, %v2479_v45  ;;  %v1349_v46 = vsel %vm367_vm0, %v2479_v45, 0 }
  0xf9   : > { %v2780_v54 = vpop.f32.mrb[8].mxu1  ;;  %2792 = vmatprep.mubr.msk.bf16.mxu0 %vm342_vm1, %v3161_v50 }
  0xfa   : > { %v650_v56 = vpop.f32.mrb[9].mxu1  ;;  %2793 = vmatmul.mubr.msk.bf16.gmra.mrb[20].mxu0 %vm342_vm1, %v3159_v47  ;;  %v2405_v59 = vclamps-f32 %v2780_v54, 1.0  ;;  %v2758_v62 = vpop.f32.mrb[4].mxu0 }
  0xfb   : > { %v2781_v58 = vpop.f32.mrb[10].mxu1  ;;  %v2403_v63 = vclamps-f32 %v650_v56, 1.0  ;;  %v2385_v1 = vclamps-f32 %v2758_v62, 1.0  ;;  %v421_v2 = vpop.f32.mrb[5].mxu0 }
  0xfc   : > { %v2406_v60 = vclamps-f32 %v2781_v58, 1.0  ;;  %v653_v61 = vpop.f32.mrb[11].mxu1  ;;  %v2383_v4 = vclamps-f32 %v421_v2, 1.0  ;;  %v2759_v5 = vpop.f32.mrb[6].mxu0 }
  0xfd   : > { %v2404_v0 = vclamps-f32 %v653_v61, 1.0  ;;  %v2386_v7 = vclamps-f32 %v2759_v5, 1.0  ;;  %v424_v8 = vpop.f32.mrb[7].mxu0 }
  0xfe   : > { %v3167_v3 = vpack.c.bf16 %v2406_v60, %v2405_v59  ;;  %v2384_v9 = vclamps-f32 %v424_v8, 1.0 }
  0xff   : > { %v3169_v6 = vpack.c.bf16 %v2404_v0, %v2403_v63  ;;  %v716_v11 = vpack.c.bf16 %v2386_v7, %v2385_v1  ;;  %v1181_v63 = vsel %vm367_vm0, %v2428_v44, 0 }
 0x100   : > { %v715_v13 = vpack.c.bf16 %v2384_v9, %v2383_v4 }
 0x101   : > { %v2784_v10 = vpop.f32.mrb[12].mxu1  ;;  %2796 = vmatprep.mubr.msk.bf16.mxu0 %vm342_vm1, %v3169_v6 }
 0x102   : > { %v666_v12 = vpop.f32.mrb[13].mxu1  ;;  %2797 = vmatmul.mubr.msk.bf16.gmra.mrb[24].mxu0 %vm342_vm1, %v3167_v3  ;;  %v2409_v15 = vclamps-f32 %v2784_v10, 1.0  ;;  %v2762_v18 = vpop.f32.mrb[8].mxu0 }
 0x103   : > { %v2785_v14 = vpop.f32.mrb[14].mxu1  ;;  %v2407_v19 = vclamps-f32 %v666_v12, 1.0  ;;  %v2389_v21 = vclamps-f32 %v2762_v18, 1.0  ;;  %v437_v22 = vpop.f32.mrb[9].mxu0 }
 0x104   : > { %v2410_v16 = vclamps-f32 %v2785_v14, 1.0  ;;  %v669_v17 = vpop.f32.mrb[15].mxu1  ;;  %v2387_v24 = vclamps-f32 %v437_v22, 1.0  ;;  %v2763_v25 = vpop.f32.mrb[10].mxu0 }
 0x105   : > { %v2408_v20 = vclamps-f32 %v669_v17, 1.0  ;;  %v2390_v27 = vclamps-f32 %v2763_v25, 1.0  ;;  %v440_v28 = vpop.f32.mrb[11].mxu0 }
 0x106   : > { %v3175_v23 = vpack.c.bf16 %v2410_v16, %v2409_v15  ;;  %v2388_v29 = vclamps-f32 %v440_v28, 1.0 }
 0x107   : > { %v3177_v26 = vpack.c.bf16 %v2408_v20, %v2407_v19  ;;  %v718_v30 = vpack.c.bf16 %v2390_v27, %v2389_v21 }
 0x108   : > { %v717_v31 = vpack.c.bf16 %v2388_v29, %v2387_v24 }
 0x109   : > { %2800 = vmatprep.mubr.msk.bf16.mxu0 %vm342_vm1, %v3177_v26 }
 0x10a   : > { %2801 = vmatmul.mubr.msk.bf16.gmra.mrb[28].mxu0 %vm342_vm1, %v3175_v23  ;;  %v2766_v32 = vpop.f32.mrb[12].mxu0 }
 0x10b   : > { %2806 = vmatprep.mubr.msk.bf16.mxu0 %vm342_vm1, %v713_v57  ;;  %v2393_v35 = vclamps-f32 %v2766_v32, 1.0  ;;  %v453_v36 = vpop.f32.mrb[13].mxu0 }
 0x10c   : > { %v2391_v37 = vclamps-f32 %v453_v36, 1.0  ;;  %v2767_v38 = vpop.f32.mrb[14].mxu0 }
 0x10d   : > { %v2394_v39 = vclamps-f32 %v2767_v38, 1.0  ;;  %v456_v40 = vpop.f32.mrb[15].mxu0 }
 0x10e   : > { %v2392_v41 = vclamps-f32 %v456_v40, 1.0 }
 0x10f   : > { %v720_v42 = vpack.c.bf16 %v2394_v39, %v2393_v35 }
 0x110   : > { %v719_v43 = vpack.c.bf16 %v2392_v41, %v2391_v37 }
 0x112   : > { %2807 = vmatmul.mubr.msk.bf16.vlgmr.msra.gmra.mrb[16].mxu0 %vm342_vm1, %v714_v55 }
 0x113   : > { %2810 = vmatprep.mubr.msk.bf16.mxu0 %vm342_vm1, %v715_v13  ;;  %2859 = vmatpush3.bf16.msra.mxu0 %v1349_v46 }
 0x11a   : > { %2811 = vmatmul.mubr.msk.bf16.gmra.mrb[20].mxu0 %vm342_vm1, %v716_v11 }
 0x11b   : > { %2814 = vmatprep.mubr.msk.bf16.mxu0 %vm342_vm1, %v717_v31 }
 0x122   : > { %2815 = vmatmul.mubr.msk.bf16.gmra.mrb[24].mxu0 %vm342_vm1, %v718_v30 }
 0x123   : > { %2818 = vmatprep.mubr.msk.bf16.mxu0 %vm342_vm1, %v719_v43 }
 0x12a   : > { %2819 = vmatmul.mubr.msk.bf16.gmra.mrb[28].mxu0 %vm342_vm1, %v720_v42 }
 0x1e5   : > { %v2808_v48 = vpop.f32.mrb[16].mxu0 }
 0x1e6   : > { %v2598_v49 = vpack.c.bf16 %v2808_v48, %v2808_v48  ;;  %v949_v51 = vpop.f32.mrb[17].mxu0  ;;  %v2431_v54 = vclamps-f32 %v2808_v48, 1.0 }
 0x1e7   : > { %v2596_v52 = vpack.c.bf16 %v949_v51, %v949_v51  ;;  %v2809_v53 = vpop.f32.mrb[18].mxu0  ;;  %v2429_v58 = vclamps-f32 %v949_v51, 1.0 }
 0x1e8   : > { %1883 = vst.msk [vmem:[%s3204_s20 + $0x8] sm:$0xf] %vm1880_vm2, %v2598_v49  ;;  %v2432_v55 = vclamps-f32 %v2809_v53, 1.0  ;;  %v2599_v56 = vpack.c.bf16 %v2809_v53, %v2809_v53  ;;  %v952_v57 = vpop.f32.mrb[19].mxu0 }
 0x1e9   : > { %1881 = vst.msk [vmem:[%s3204_s20] sm:$0xf] %vm1880_vm2, %v2596_v52  ;;  %v2430_v59 = vclamps-f32 %v952_v57, 1.0  ;;  %v2597_v60 = vpack.c.bf16 %v952_v57, %v952_v57 }
 0x1ea   : > { %v3210_v61 = vpack.c.bf16 %v2432_v55, %v2431_v54  ;;  %1884 = vst.msk [vmem:[%s3204_s20 + $0xc] sm:$0xf] %vm1880_vm2, %v2599_v56 }
 0x1eb   : > { %v3214_v62 = vpack.c.bf16 %v2430_v59, %v2429_v58  ;;  %1882 = vst.msk [vmem:[%s3204_s20 + $0x4] sm:$0xf] %vm1880_vm2, %v2597_v60 }
 0x1ed   : > { %v2812_v0 = vpop.f32.mrb[20].mxu0  ;;  %2824 = vmatprep.mubr.msk.bf16.mxu1 %vm342_vm1, %v3214_v62 }
 0x1ee   : > { %v2602_v1 = vpack.c.bf16 %v2812_v0, %v2812_v0  ;;  %v965_v2 = vpop.f32.mrb[21].mxu0  ;;  %2825 = vmatmul.mubr.msk.bf16.vlgmr.msra.gmra.mrb[16].mxu1 %vm342_vm1, %v3210_v61  ;;  %v2435_v7 = vclamps-f32 %v2812_v0, 1.0 }
 0x1ef   : > { %v2600_v4 = vpack.c.bf16 %v965_v2, %v965_v2  ;;  %2841 = vmatpush3.bf16.msra.mxu1 %v1181_v63  ;;  %v2813_v5 = vpop.f32.mrb[22].mxu0  ;;  %v2433_v11 = vclamps-f32 %v965_v2, 1.0 }
 0x1f0   : > { %1887 = vst.msk [vmem:[%s3204_s20 + $0x18] sm:$0xf] %vm1880_vm2, %v2602_v1  ;;  %v2436_v8 = vclamps-f32 %v2813_v5, 1.0  ;;  %v2603_v9 = vpack.c.bf16 %v2813_v5, %v2813_v5  ;;  %v968_v10 = vpop.f32.mrb[23].mxu0 }
 0x1f1   : > { %1885 = vst.msk [vmem:[%s3204_s20 + $0x10] sm:$0xf] %vm1880_vm2, %v2600_v4  ;;  %v2434_v12 = vclamps-f32 %v968_v10, 1.0  ;;  %v2601_v13 = vpack.c.bf16 %v968_v10, %v968_v10 }
 0x1f2   : > { %v3227_v14 = vpack.c.bf16 %v2436_v8, %v2435_v7  ;;  %1888 = vst.msk [vmem:[%s3204_s20 + $0x1c] sm:$0xf] %vm1880_vm2, %v2603_v9 }
 0x1f3   : > { %v3231_v15 = vpack.c.bf16 %v2434_v12, %v2433_v11  ;;  %1886 = vst.msk [vmem:[%s3204_s20 + $0x14] sm:$0xf] %vm1880_vm2, %v2601_v13 }
 0x1f5   : > { %v2816_v16 = vpop.f32.mrb[24].mxu0  ;;  %2828 = vmatprep.mubr.msk.bf16.mxu1 %vm342_vm1, %v3231_v15 }
 0x1f6   : > { %v2606_v17 = vpack.c.bf16 %v2816_v16, %v2816_v16  ;;  %v981_v18 = vpop.f32.mrb[25].mxu0  ;;  %2829 = vmatmul.mubr.msk.bf16.gmra.mrb[20].mxu1 %vm342_vm1, %v3227_v14  ;;  %v2439_v21 = vclamps-f32 %v2816_v16, 1.0 }
 0x1f7   : > { %v2604_v19 = vpack.c.bf16 %v981_v18, %v981_v18  ;;  %v2817_v20 = vpop.f32.mrb[26].mxu0  ;;  %v2437_v27 = vclamps-f32 %v981_v18, 1.0 }
 0x1f8   : > { %1891 = vst.msk [vmem:[%s3204_s20 + $0x28] sm:$0xf] %vm1880_vm2, %v2606_v17  ;;  %v2440_v22 = vclamps-f32 %v2817_v20, 1.0  ;;  %v2607_v24 = vpack.c.bf16 %v2817_v20, %v2817_v20  ;;  %v984_v25 = vpop.f32.mrb[27].mxu0 }
 0x1f9   : > { %1889 = vst.msk [vmem:[%s3204_s20 + $0x20] sm:$0xf] %vm1880_vm2, %v2604_v19  ;;  %v2438_v28 = vclamps-f32 %v984_v25, 1.0  ;;  %v2605_v29 = vpack.c.bf16 %v984_v25, %v984_v25  ;;  %v2513_v25 = vld [vmem:[%s3525_s4 + $0xe] sm:$0x3] }
 0x1fa   : > { %v3243_v30 = vpack.c.bf16 %v2440_v22, %v2439_v21  ;;  %1892 = vst.msk [vmem:[%s3204_s20 + $0x2c] sm:$0xf] %vm1880_vm2, %v2607_v24  ;;  %3002 = vmatprep.subr.msk.bf16.mxu1 %vm367_vm0, %v2513_v25 }
 0x1fb   : > { %v3247_v31 = vpack.c.bf16 %v2438_v28, %v2437_v27  ;;  %1890 = vst.msk [vmem:[%s3204_s20 + $0x24] sm:$0xf] %vm1880_vm2, %v2605_v29  ;;  %v1617_v28 = vsel %vm367_vm0, %v2513_v25, 0 }
 0x1fd   : > { %v2820_v32 = vpop.f32.mrb[28].mxu0  ;;  %2832 = vmatprep.mubr.msk.bf16.mxu1 %vm342_vm1, %v3247_v31 }
 0x1fe   : > { %v2610_v35 = vpack.c.bf16 %v2820_v32, %v2820_v32  ;;  %v997_v36 = vpop.f32.mrb[29].mxu0  ;;  %2833 = vmatmul.mubr.msk.bf16.gmra.mrb[24].mxu1 %vm342_vm1, %v3243_v30  ;;  %v2443_v39 = vclamps-f32 %v2820_v32, 1.0 }
 0x1ff   : > { %v2608_v37 = vpack.c.bf16 %v997_v36, %v997_v36  ;;  %v2821_v38 = vpop.f32.mrb[30].mxu0  ;;  %v2441_v43 = vclamps-f32 %v997_v36, 1.0 }
 0x200   : > { %1895 = vst.msk [vmem:[%s3204_s20 + $0x38] sm:$0xf] %vm1880_vm2, %v2610_v35  ;;  %v2444_v40 = vclamps-f32 %v2821_v38, 1.0  ;;  %v2611_v41 = vpack.c.bf16 %v2821_v38, %v2821_v38  ;;  %v1000_v42 = vpop.f32.mrb[31].mxu0 }
 0x201   : > { %1893 = vst.msk [vmem:[%s3204_s20 + $0x30] sm:$0xf] %vm1880_vm2, %v2608_v37  ;;  %v2442_v44 = vclamps-f32 %v1000_v42, 1.0  ;;  %v2609_v45 = vpack.c.bf16 %v1000_v42, %v1000_v42 }
 0x202   : > { %v3259_v46 = vpack.c.bf16 %v2444_v40, %v2443_v39  ;;  %1896 = vst.msk [vmem:[%s3204_s20 + $0x3c] sm:$0xf] %vm1880_vm2, %v2611_v41 }
 0x203   : > { %v3263_v48 = vpack.c.bf16 %v2442_v44, %v2441_v43  ;;  %1894 = vst.msk [vmem:[%s3204_s20 + $0x34] sm:$0xf] %vm1880_vm2, %v2609_v45 }
 0x205   : > { %2836 = vmatprep.mubr.msk.bf16.mxu1 %vm342_vm1, %v3263_v48 }
 0x206   : > { %2837 = vmatmul.mubr.msk.bf16.gmra.mrb[28].mxu1 %vm342_vm1, %v3259_v46 }
 0x207   : > { %2842 = vmatprep.mubr.msk.bf16.mxu1 %vm342_vm1, %v3152_v34 }
 0x20e   : > { %2843 = vmatmul.mubr.msk.bf16.vlgmr.msra.gmra.mrb[16].mxu1 %vm342_vm1, %v3150_v33  ;;  %v2462_v33 = vld [vmem:[%s3525_s4 + $0x8] sm:$0x3] }
 0x20f   : > { %2846 = vmatprep.mubr.msk.bf16.mxu1 %vm342_vm1, %v3161_v50  ;;  %3001 = vmatprep.subr.msk.bf16.mxu0 %vm367_vm0, %v2462_v33  ;;  %v1449_v57 = vsel %vm367_vm0, %v2462_v33, 0 }
 0x210   : > { %2895 = vmatpush3.bf16.msra.mxu1 %v1617_v28 }
 0x216   : > { %2847 = vmatmul.mubr.msk.bf16.gmra.mrb[20].mxu1 %vm342_vm1, %v3159_v47 }
 0x217   : > { %2850 = vmatprep.mubr.msk.bf16.mxu1 %vm342_vm1, %v3169_v6 }
 0x21e   : > { %2851 = vmatmul.mubr.msk.bf16.gmra.mrb[24].mxu1 %vm342_vm1, %v3167_v3 }
 0x21f   : > { %2854 = vmatprep.mubr.msk.bf16.mxu1 %vm342_vm1, %v3177_v26 }
 0x226   : > { %2855 = vmatmul.mubr.msk.bf16.gmra.mrb[28].mxu1 %vm342_vm1, %v3175_v23 }
 0x2e1   : > { %v2844_v34 = vpop.f32.mrb[16].mxu1 }
 0x2e2   : > { %v1217_v47 = vpop.f32.mrb[17].mxu1  ;;  %v2614_v50 = vpack.c.bf16 %v2844_v34, %v2844_v34  ;;  %v2465_v51 = vclamps-f32 %v2844_v34, 1.0 }
 0x2e3   : > { %v2845_v49 = vpop.f32.mrb[18].mxu1  ;;  %v2612_v6 = vpack.c.bf16 %v1217_v47, %v1217_v47  ;;  %v2463_v26 = vclamps-f32 %v1217_v47, 1.0 }
 0x2e4   : > { %v2466_v52 = vclamps-f32 %v2845_v49, 1.0  ;;  %1949 = vrot.lane.b32.xlu1 %v2614_v50, %s3023_s23  ;;  %v1220_v3 = vpop.f32.mrb[19].mxu1  ;;  %v2615_v54 = vpack.c.bf16 %v2845_v49, %v2845_v49  ;;  %v2496_v49 = vld [vmem:[%s3525_s4 + $0xc] sm:$0x3] }
 0x2e5   : > { %v2464_v53 = vclamps-f32 %v1220_v3, 1.0  ;;  %1945 = vrot.lane.b32.xlu0 %v2612_v6, %s3023_s23  ;;  %v2613_v56 = vpack.c.bf16 %v1220_v3, %v1220_v3  ;;  %3003 = vmatprep.subr.msk.bf16.mxu1 %vm367_vm0, %v2496_v49 }
 0x2e6   : > { %v3293_v23 = vpack.c.bf16 %v2466_v52, %v2465_v51 }
 0x2e7   : > { %v3295_v55 = vpack.c.bf16 %v2464_v53, %v2463_v26 }
 0x2e8   : > { %1951 = vrot.lane.b32.xlu1 %v2615_v54, %s3023_s23 }
 0x2e9   : > { %1947 = vrot.lane.b32.xlu0 %v2613_v56, %s3023_s23  ;;  %v2848_v58 = vpop.f32.mrb[20].mxu1  ;;  %2860 = vmatprep.mubr.msk.bf16.mxu0 %vm342_vm1, %v3295_v55 }
 0x2ea   : > { %v2618_v59 = vpack.c.bf16 %v2848_v58, %v2848_v58  ;;  %v1233_v60 = vpop.f32.mrb[21].mxu1  ;;  %2861 = vmatmul.mubr.msk.bf16.vlgmr.msra.gmra.mrb[32].mxu0 %vm342_vm1, %v3293_v23  ;;  %v2469_v0 = vclamps-f32 %v2848_v58, 1.0 }
 0x2eb   : > { %2877 = vmatpush3.bf16.msra.mxu0 %v1449_v57  ;;  %v2849_v63 = vpop.f32.mrb[22].mxu1  ;;  %v2467_v5 = vclamps-f32 %v1233_v60, 1.0  ;;  %v2616_v9 = vpack.c.bf16 %v1233_v60, %v1233_v60 }
 0x2ec   : > { %v2470_v1 = vclamps-f32 %v2849_v63, 1.0  ;;  %v2619_v2 = vpack.c.bf16 %v2849_v63, %v2849_v63  ;;  %v1236_v4 = vpop.f32.mrb[23].mxu1 }
 0x2ed   : > { %v2468_v7 = vclamps-f32 %v1236_v4, 1.0  ;;  %1957 = vrot.lane.b32.xlu0 %v2618_v59, %s3023_s23  ;;  %v2617_v11 = vpack.c.bf16 %v1236_v4, %v1236_v4 }
 0x2ee   : > { %v3305_v8 = vpack.c.bf16 %v2470_v1, %v2469_v0  ;;  %1959 = vrot.lane.b32.xlu1 %v2619_v2, %s3023_s23 }
 0x2ef   : > { %v3308_v10 = vpack.c.bf16 %v2468_v7, %v2467_v5 }
 0x2f1   : > { %1953 = vrot.lane.b32.xlu0 %v2616_v9, %s3023_s23  ;;  %v2852_v12 = vpop.f32.mrb[24].mxu1  ;;  %2864 = vmatprep.mubr.msk.bf16.mxu0 %vm342_vm1, %v3308_v10 }
 0x2f2   : > { %v2622_v13 = vpack.c.bf16 %v2852_v12, %v2852_v12  ;;  %1955 = vrot.lane.b32.xlu1 %v2617_v11, %s3023_s23  ;;  %v1249_v16 = vpop.f32.mrb[25].mxu1  ;;  %2865 = vmatmul.mubr.msk.bf16.gmra.mrb[36].mxu0 %vm342_vm1, %v3305_v8  ;;  %v2473_v18 = vclamps-f32 %v2852_v12, 1.0 }
 0x2f3   : > { %v2853_v17 = vpop.f32.mrb[26].mxu1  ;;  %v2471_v22 = vclamps-f32 %v1249_v16, 1.0  ;;  %v2620_v29 = vpack.c.bf16 %v1249_v16, %v1249_v16 }
 0x2f4   : > { %v2474_v19 = vclamps-f32 %v2853_v17, 1.0  ;;  %v2623_v20 = vpack.c.bf16 %v2853_v17, %v2853_v17  ;;  %v1252_v21 = vpop.f32.mrb[27].mxu1 }
 0x2f5   : > { %v2472_v24 = vclamps-f32 %v1252_v21, 1.0  ;;  %1965 = vrot.lane.b32.xlu0 %v2622_v13, %s3023_s23  ;;  %v2621_v35 = vpack.c.bf16 %v1252_v21, %v1252_v21  ;;  %v1717_v13 = vsel %vm367_vm0, %v2496_v49, 0 }
 0x2f6   : > { %v3320_v27 = vpack.c.bf16 %v2474_v19, %v2473_v18  ;;  %1967 = vrot.lane.b32.xlu1 %v2623_v20, %s3023_s23 }
 0x2f7   : > { %v3325_v32 = vpack.c.bf16 %v2472_v24, %v2471_v22 }
 0x2f9   : > { %1961 = vrot.lane.b32.xlu0 %v2620_v29, %s3023_s23  ;;  %v2856_v36 = vpop.f32.mrb[28].mxu1  ;;  %2868 = vmatprep.mubr.msk.bf16.mxu0 %vm342_vm1, %v3325_v32 }
 0x2fa   : > { %v2626_v37 = vpack.c.bf16 %v2856_v36, %v2856_v36  ;;  %1963 = vrot.lane.b32.xlu1 %v2621_v35, %s3023_s23  ;;  %v1265_v38 = vpop.f32.mrb[29].mxu1  ;;  %2869 = vmatmul.mubr.msk.bf16.gmra.mrb[40].mxu0 %vm342_vm1, %v3320_v27  ;;  %v2477_v40 = vclamps-f32 %v2856_v36, 1.0 }
 0x2fb   : > { %v2857_v39 = vpop.f32.mrb[30].mxu1  ;;  %v2475_v44 = vclamps-f32 %v1265_v38, 1.0  ;;  %v2624_v34 = vpack.c.bf16 %v1265_v38, %v1265_v38 }
 0x2fc   : > { %v2478_v41 = vclamps-f32 %v2857_v39, 1.0  ;;  %v2627_v42 = vpack.c.bf16 %v2857_v39, %v2857_v39  ;;  %v1268_v43 = vpop.f32.mrb[31].mxu1 }
 0x2fd   : > { %v2476_v45 = vclamps-f32 %v1268_v43, 1.0  ;;  %1973 = vrot.lane.b32.xlu0 %v2626_v37, %s3023_s23  ;;  %v2625_v50 = vpack.c.bf16 %v1268_v43, %v1268_v43 }
 0x2fe   : > { %v3334_v33 = vpack.c.bf16 %v2478_v41, %v2477_v40  ;;  %1975 = vrot.lane.b32.xlu1 %v2627_v42, %s3023_s23 }
 0x2ff   : > { %v3337_v47 = vpack.c.bf16 %v2476_v45, %v2475_v44 }
 0x301   : > { %1969 = vrot.lane.b32.xlu0 %v2624_v34, %s3023_s23  ;;  %2872 = vmatprep.mubr.msk.bf16.mxu0 %vm342_vm1, %v3337_v47 }
 0x302   : > { %1971 = vrot.lane.b32.xlu1 %v2625_v50, %s3023_s23  ;;  %2873 = vmatmul.mubr.msk.bf16.gmra.mrb[44].mxu0 %vm342_vm1, %v3334_v33 }
 0x303   : > { %2878 = vmatprep.mubr.msk.bf16.mxu0 %vm342_vm1, %v3214_v62 }
 0x30a   : > { %2879 = vmatmul.mubr.msk.bf16.vlgmr.msra.gmra.mrb[32].mxu0 %vm342_vm1, %v3210_v61 }
 0x30b   : > { %2882 = vmatprep.mubr.msk.bf16.mxu0 %vm342_vm1, %v3231_v15 }
 0x312   : > { %2883 = vmatmul.mubr.msk.bf16.gmra.mrb[36].mxu0 %vm342_vm1, %v3227_v14 }
 0x313   : > { %2886 = vmatprep.mubr.msk.bf16.mxu0 %vm342_vm1, %v3247_v31 }
 0x31a   : > { %2887 = vmatmul.mubr.msk.bf16.gmra.mrb[40].mxu0 %vm342_vm1, %v3243_v30 }
 0x31b   : > { %2890 = vmatprep.mubr.msk.bf16.mxu0 %vm342_vm1, %v3263_v48 }
 0x322   : > { %2891 = vmatmul.mubr.msk.bf16.gmra.mrb[44].mxu0 %vm342_vm1, %v3259_v46 }
 0x356   : > { %v1950_v61 = vpop.permute.xlu1 %1949 }
 0x357   : > { %1996 = vst.msk [vmem:[%s3204_s20 + $0x8] sm:$0xf] %vm1993_vm3, %v1950_v61  ;;  %v1946_v62 = vpop.permute.xlu0 %1945 }
 0x358   : > { %1994 = vst.msk [vmem:[%s3204_s20] sm:$0xf] %vm1993_vm3, %v1946_v62 }
 0x35a   : > { %v1952_v14 = vpop.permute.xlu1 %1951 }
 0x35b   : > { %1997 = vst.msk [vmem:[%s3204_s20 + $0xc] sm:$0xf] %vm1993_vm3, %v1952_v14  ;;  %v1948_v15 = vpop.permute.xlu0 %1947 }
 0x35c   : > { %1995 = vst.msk [vmem:[%s3204_s20 + $0x4] sm:$0xf] %vm1993_vm3, %v1948_v15 }
 0x35f   : > { %v1958_v30 = vpop.permute.xlu0 %1957 }
 0x360   : > { %2000 = vst.msk [vmem:[%s3204_s20 + $0x18] sm:$0xf] %vm1993_vm3, %v1958_v30  ;;  %v1960_v31 = vpop.permute.xlu1 %1959 }
 0x361   : > { %2001 = vst.msk [vmem:[%s3204_s20 + $0x1c] sm:$0xf] %vm1993_vm3, %v1960_v31 }
 0x363   : > { %v1954_v46 = vpop.permute.xlu0 %1953 }
 0x364   : > { %1998 = vst.msk [vmem:[%s3204_s20 + $0x10] sm:$0xf] %vm1993_vm3, %v1954_v46  ;;  %v1956_v48 = vpop.permute.xlu1 %1955 }
 0x365   : > { %1999 = vst.msk [vmem:[%s3204_s20 + $0x14] sm:$0xf] %vm1993_vm3, %v1956_v48 }
 0x367   : > { %v1966_v6 = vpop.permute.xlu0 %1965 }
 0x368   : > { %2004 = vst.msk [vmem:[%s3204_s20 + $0x28] sm:$0xf] %vm1993_vm3, %v1966_v6  ;;  %v1968_v51 = vpop.permute.xlu1 %1967 }
 0x369   : > { %2005 = vst.msk [vmem:[%s3204_s20 + $0x2c] sm:$0xf] %vm1993_vm3, %v1968_v51 }
 0x36b   : > { %v1962_v52 = vpop.permute.xlu0 %1961 }
 0x36c   : > { %2002 = vst.msk [vmem:[%s3204_s20 + $0x20] sm:$0xf] %vm1993_vm3, %v1962_v52  ;;  %v1964_v3 = vpop.permute.xlu1 %1963 }
 0x36d   : > { %2003 = vst.msk [vmem:[%s3204_s20 + $0x24] sm:$0xf] %vm1993_vm3, %v1964_v3 }
 0x36f   : > { %v1974_v26 = vpop.permute.xlu0 %1973 }
 0x370   : > { %2008 = vst.msk [vmem:[%s3204_s20 + $0x38] sm:$0xf] %vm1993_vm3, %v1974_v26  ;;  %v1976_v53 = vpop.permute.xlu1 %1975 }
 0x371   : > { %2009 = vst.msk [vmem:[%s3204_s20 + $0x3c] sm:$0xf] %vm1993_vm3, %v1976_v53 }
 0x373   : > { %v1970_v54 = vpop.permute.xlu0 %1969 }
 0x374   : > { %2006 = vst.msk [vmem:[%s3204_s20 + $0x30] sm:$0xf] %vm1993_vm3, %v1970_v54  ;;  %v1972_v56 = vpop.permute.xlu1 %1971 }
 0x375   : > { %2007 = vst.msk [vmem:[%s3204_s20 + $0x34] sm:$0xf] %vm1993_vm3, %v1972_v56 }
 0x3dd   : > { %v2880_v57 = vpop.f32.mrb[32].mxu0 }
 0x3de   : > { %v2630_v58 = vpack.c.bf16 %v2880_v57, %v2880_v57  ;;  %v1485_v59 = vpop.f32.mrb[33].mxu0  ;;  %v2499_v63 = vclamps-f32 %v2880_v57, 1.0 }
 0x3df   : > { %v2881_v60 = vpop.f32.mrb[34].mxu0  ;;  %v2497_v4 = vclamps-f32 %v1485_v59, 1.0  ;;  %v2628_v7 = vpack.c.bf16 %v1485_v59, %v1485_v59 }
 0x3e0   : > { %v2500_v0 = vclamps-f32 %v2881_v60, 1.0  ;;  %v2631_v1 = vpack.c.bf16 %v2881_v60, %v2881_v60  ;;  %2062 = vrot.lane.b32.xlu0 %v2630_v58, %s3024_s28  ;;  %v1488_v2 = vpop.f32.mrb[35].mxu0 }
 0x3e1   : > { %v2498_v5 = vclamps-f32 %v1488_v2, 1.0  ;;  %v2629_v12 = vpack.c.bf16 %v1488_v2, %v1488_v2 }
 0x3e2   : > { %v1583_v9 = vpack.c.bf16 %v2500_v0, %v2499_v63  ;;  %2064 = vrot.lane.b32.xlu1 %v2631_v1, %s3024_s28 }
 0x3e3   : > { %v1582_v11 = vpack.c.bf16 %v2498_v5, %v2497_v4 }
 0x3e4   : > { %2058 = vrot.lane.b32.xlu0 %v2628_v7, %s3024_s28 }
 0x3e5   : > { %v2884_v16 = vpop.f32.mrb[36].mxu0  ;;  %2896 = vmatprep.mubr.msk.bf16.mxu1 %vm342_vm1, %v1582_v11 }
 0x3e6   : > { %v2634_v17 = vpack.c.bf16 %v2884_v16, %v2884_v16  ;;  %2060 = vrot.lane.b32.xlu1 %v2629_v12, %s3024_s28  ;;  %v1501_v18 = vpop.f32.mrb[37].mxu0  ;;  %2897 = vmatmul.mubr.msk.bf16.vlgmr.msra.gmra.mrb[32].mxu1 %vm342_vm1, %v1583_v9  ;;  %v2503_v20 = vclamps-f32 %v2884_v16, 1.0 }
 0x3e7   : > { %2913 = vmatpush3.bf16.msra.mxu1 %v1717_v13  ;;  %v2885_v19 = vpop.f32.mrb[38].mxu0  ;;  %v2501_v25 = vclamps-f32 %v1501_v18, 1.0  ;;  %v2632_v29 = vpack.c.bf16 %v1501_v18, %v1501_v18 }
 0x3e8   : > { %v2504_v21 = vclamps-f32 %v2885_v19, 1.0  ;;  %v2635_v22 = vpack.c.bf16 %v2885_v19, %v2885_v19  ;;  %2070 = vrot.lane.b32.xlu0 %v2634_v17, %s3024_s28  ;;  %v1504_v24 = vpop.f32.mrb[39].mxu0 }
 0x3e9   : > { %v2502_v28 = vclamps-f32 %v1504_v24, 1.0  ;;  %v2633_v37 = vpack.c.bf16 %v1504_v24, %v1504_v24 }
 0x3ea   : > { %v1585_v35 = vpack.c.bf16 %v2504_v21, %v2503_v20  ;;  %2072 = vrot.lane.b32.xlu1 %v2635_v22, %s3024_s28 }
 0x3eb   : > { %v1584_v36 = vpack.c.bf16 %v2502_v28, %v2501_v25 }
 0x3ec   : > { %2066 = vrot.lane.b32.xlu0 %v2632_v29, %s3024_s28 }
 0x3ed   : > { %v2888_v38 = vpop.f32.mrb[40].mxu0  ;;  %2900 = vmatprep.mubr.msk.bf16.mxu1 %vm342_vm1, %v1584_v36 }
 0x3ee   : > { %v2638_v39 = vpack.c.bf16 %v2888_v38, %v2888_v38  ;;  %2068 = vrot.lane.b32.xlu1 %v2633_v37, %s3024_s28  ;;  %v1517_v40 = vpop.f32.mrb[41].mxu0  ;;  %2901 = vmatmul.mubr.msk.bf16.gmra.mrb[36].mxu1 %vm342_vm1, %v1585_v35  ;;  %v2507_v42 = vclamps-f32 %v2888_v38, 1.0 }
 0x3ef   : > { %v2889_v41 = vpop.f32.mrb[42].mxu0  ;;  %v2505_v34 = vclamps-f32 %v1517_v40, 1.0  ;;  %v2636_v61 = vpack.c.bf16 %v1517_v40, %v1517_v40 }
 0x3f0   : > { %v2508_v43 = vclamps-f32 %v2889_v41, 1.0  ;;  %v2639_v44 = vpack.c.bf16 %v2889_v41, %v2889_v41  ;;  %2078 = vrot.lane.b32.xlu0 %v2638_v39, %s3024_s28  ;;  %v1520_v45 = vpop.f32.mrb[43].mxu0 }
 0x3f1   : > { %v2506_v50 = vclamps-f32 %v1520_v45, 1.0  ;;  %v2637_v15 = vpack.c.bf16 %v1520_v45, %v1520_v45 }
 0x3f2   : > { %v1587_v62 = vpack.c.bf16 %v2508_v43, %v2507_v42  ;;  %2080 = vrot.lane.b32.xlu1 %v2639_v44, %s3024_s28 }
 0x3f3   : > { %v1586_v14 = vpack.c.bf16 %v2506_v50, %v2505_v34 }
 0x3f4   : > { %2074 = vrot.lane.b32.xlu0 %v2636_v61, %s3024_s28 }
 0x3f5   : > { %v2892_v30 = vpop.f32.mrb[44].mxu0  ;;  %2904 = vmatprep.mubr.msk.bf16.mxu1 %vm342_vm1, %v1586_v14 }
 0x3f6   : > { %v2642_v31 = vpack.c.bf16 %v2892_v30, %v2892_v30  ;;  %2076 = vrot.lane.b32.xlu1 %v2637_v15, %s3024_s28  ;;  %v1533_v46 = vpop.f32.mrb[45].mxu0  ;;  %2905 = vmatmul.mubr.msk.bf16.gmra.mrb[40].mxu1 %vm342_vm1, %v1587_v62  ;;  %v2511_v49 = vclamps-f32 %v2892_v30, 1.0 }
 0x3f7   : > { %v2893_v48 = vpop.f32.mrb[46].mxu0  ;;  %v2509_v3 = vclamps-f32 %v1533_v46, 1.0  ;;  %v2640_v53 = vpack.c.bf16 %v1533_v46, %v1533_v46 }
 0x3f8   : > { %v2512_v6 = vclamps-f32 %v2893_v48, 1.0  ;;  %v2643_v51 = vpack.c.bf16 %v2893_v48, %v2893_v48  ;;  %2086 = vrot.lane.b32.xlu0 %v2642_v31, %s3024_s28  ;;  %v1536_v52 = vpop.f32.mrb[47].mxu0 }
 0x3f9   : > { %v2510_v26 = vclamps-f32 %v1536_v52, 1.0  ;;  %v2641_v57 = vpack.c.bf16 %v1536_v52, %v1536_v52 }
 0x3fa   : > { %v1589_v54 = vpack.c.bf16 %v2512_v6, %v2511_v49  ;;  %2088 = vrot.lane.b32.xlu1 %v2643_v51, %s3024_s28 }
 0x3fb   : > { %v1588_v56 = vpack.c.bf16 %v2510_v26, %v2509_v3 }
 0x3fc   : > { %2082 = vrot.lane.b32.xlu0 %v2640_v53, %s3024_s28 }
 0x3fd   : > { %2908 = vmatprep.mubr.msk.bf16.mxu1 %vm342_vm1, %v1588_v56 }
 0x3fe   : > { %2084 = vrot.lane.b32.xlu1 %v2641_v57, %s3024_s28  ;;  %2909 = vmatmul.mubr.msk.bf16.gmra.mrb[44].mxu1 %vm342_vm1, %v1589_v54 }
 0x3ff   : > { %2914 = vmatprep.mubr.msk.bf16.mxu1 %vm342_vm1, %v3295_v55 }
 0x406   : > { %2915 = vmatmul.mubr.msk.bf16.vlgmr.msra.gmra.mrb[32].mxu1 %vm342_vm1, %v3293_v23 }
 0x407   : > { %2918 = vmatprep.mubr.msk.bf16.mxu1 %vm342_vm1, %v3308_v10 }
 0x40e   : > { %2919 = vmatmul.mubr.msk.bf16.gmra.mrb[36].mxu1 %vm342_vm1, %v3305_v8 }
 0x40f   : > { %2922 = vmatprep.mubr.msk.bf16.mxu1 %vm342_vm1, %v3325_v32 }
 0x416   : > { %2923 = vmatmul.mubr.msk.bf16.gmra.mrb[40].mxu1 %vm342_vm1, %v3320_v27 }
 0x417   : > { %2926 = vmatprep.mubr.msk.bf16.mxu1 %vm342_vm1, %v3337_v47 }
 0x41e   : > { %2927 = vmatmul.mubr.msk.bf16.gmra.mrb[44].mxu1 %vm342_vm1, %v3334_v33 }
 0x452   : > { %v2063_v23 = vpop.permute.xlu0 %2062 }
 0x453   : > { %2109 = vst.msk [vmem:[%s3204_s20 + $0x8] sm:$0xf] %vm2106_vm4, %v2063_v23 }
 0x454   : > { %v2065_v55 = vpop.permute.xlu1 %2064 }
 0x455   : > { %2110 = vst.msk [vmem:[%s3204_s20 + $0xc] sm:$0xf] %vm2106_vm4, %v2065_v55 }
 0x456   : > { %v2059_v8 = vpop.permute.xlu0 %2058 }
 0x457   : > { %2107 = vst.msk [vmem:[%s3204_s20] sm:$0xf] %vm2106_vm4, %v2059_v8 }
 0x458   : > { %v2061_v10 = vpop.permute.xlu1 %2060 }
 0x459   : > { %2108 = vst.msk [vmem:[%s3204_s20 + $0x4] sm:$0xf] %vm2106_vm4, %v2061_v10 }
 0x45a   : > { %v2071_v27 = vpop.permute.xlu0 %2070 }
 0x45b   : > { %2113 = vst.msk [vmem:[%s3204_s20 + $0x18] sm:$0xf] %vm2106_vm4, %v2071_v27 }
 0x45c   : > { %v2073_v32 = vpop.permute.xlu1 %2072 }
 0x45d   : > { %2114 = vst.msk [vmem:[%s3204_s20 + $0x1c] sm:$0xf] %vm2106_vm4, %v2073_v32 }
 0x45e   : > { %v2067_v33 = vpop.permute.xlu0 %2066 }
 0x45f   : > { %2111 = vst.msk [vmem:[%s3204_s20 + $0x10] sm:$0xf] %vm2106_vm4, %v2067_v33 }
 0x460   : > { %v2069_v47 = vpop.permute.xlu1 %2068 }
 0x461   : > { %2112 = vst.msk [vmem:[%s3204_s20 + $0x14] sm:$0xf] %vm2106_vm4, %v2069_v47 }
 0x462   : > { %v2079_v58 = vpop.permute.xlu0 %2078 }
 0x463   : > { %2117 = vst.msk [vmem:[%s3204_s20 + $0x28] sm:$0xf] %vm2106_vm4, %v2079_v58 }
 0x464   : > { %v2081_v59 = vpop.permute.xlu1 %2080 }
 0x465   : > { %2118 = vst.msk [vmem:[%s3204_s20 + $0x2c] sm:$0xf] %vm2106_vm4, %v2081_v59 }
 0x466   : > { %v2075_v60 = vpop.permute.xlu0 %2074 }
 0x467   : > { %2115 = vst.msk [vmem:[%s3204_s20 + $0x20] sm:$0xf] %vm2106_vm4, %v2075_v60 }
 0x468   : > { %v2077_v63 = vpop.permute.xlu1 %2076 }
 0x469   : > { %2116 = vst.msk [vmem:[%s3204_s20 + $0x24] sm:$0xf] %vm2106_vm4, %v2077_v63 }
 0x46a   : > { %v2087_v0 = vpop.permute.xlu0 %2086 }
 0x46b   : > { %2121 = vst.msk [vmem:[%s3204_s20 + $0x38] sm:$0xf] %vm2106_vm4, %v2087_v0 }
 0x46c   : > { %v2089_v1 = vpop.permute.xlu1 %2088 }
 0x46d   : > { %2122 = vst.msk [vmem:[%s3204_s20 + $0x3c] sm:$0xf] %vm2106_vm4, %v2089_v1 }
 0x46e   : > { %v2083_v2 = vpop.permute.xlu0 %2082 }
 0x46f   : > { %2119 = vst.msk [vmem:[%s3204_s20 + $0x30] sm:$0xf] %vm2106_vm4, %v2083_v2 }
 0x470   : > { %v2085_v4 = vpop.permute.xlu1 %2084 }
 0x471   : > { %2120 = vst.msk [vmem:[%s3204_s20 + $0x34] sm:$0xf] %vm2106_vm4, %v2085_v4 }
 0x4d9   : > { %v2916_v5 = vpop.f32.mrb[32].mxu1 }
 0x4da   : > { %v2646_v7 = vpack.c.bf16 %v2916_v5, %v2916_v5  ;;  %v1753_v9 = vpop.f32.mrb[33].mxu1 }
 0x4db   : > { %v2917_v11 = vpop.f32.mrb[34].mxu1  ;;  %v2644_v16 = vpack.c.bf16 %v1753_v9, %v1753_v9 }
 0x4dc   : > { %v2647_v12 = vpack.c.bf16 %v2917_v11, %v2917_v11  ;;  %2175 = vrot.lane.b32.xlu0 %v2646_v7, %s3025_s29  ;;  %v1756_v13 = vpop.f32.mrb[35].mxu1 }
 0x4dd   : > { %v2645_v17 = vpack.c.bf16 %v1756_v13, %v1756_v13 }
 0x4de   : > { %2177 = vrot.lane.b32.xlu1 %v2647_v12, %s3025_s29 }
 0x4e0   : > { %2171 = vrot.lane.b32.xlu0 %v2644_v16, %s3025_s29 }
 0x4e1   : > { %v2920_v18 = vpop.f32.mrb[36].mxu1 }
 0x4e2   : > { %v2650_v19 = vpack.c.bf16 %v2920_v18, %v2920_v18  ;;  %2173 = vrot.lane.b32.xlu1 %v2645_v17, %s3025_s29  ;;  %v1769_v20 = vpop.f32.mrb[37].mxu1 }
 0x4e3   : > { %v2921_v21 = vpop.f32.mrb[38].mxu1  ;;  %v2648_v25 = vpack.c.bf16 %v1769_v20, %v1769_v20 }
 0x4e4   : > { %v2651_v22 = vpack.c.bf16 %v2921_v21, %v2921_v21  ;;  %2183 = vrot.lane.b32.xlu0 %v2650_v19, %s3025_s29  ;;  %v1772_v24 = vpop.f32.mrb[39].mxu1 }
 0x4e5   : > { %v2649_v28 = vpack.c.bf16 %v1772_v24, %v1772_v24 }
 0x4e6   : > { %2185 = vrot.lane.b32.xlu1 %v2651_v22, %s3025_s29 }
 0x4e8   : > { %2179 = vrot.lane.b32.xlu0 %v2648_v25, %s3025_s29 }
 0x4e9   : > { %v2924_v29 = vpop.f32.mrb[40].mxu1 }
 0x4ea   : > { %v2654_v35 = vpack.c.bf16 %v2924_v29, %v2924_v29  ;;  %2181 = vrot.lane.b32.xlu1 %v2649_v28, %s3025_s29  ;;  %v1785_v36 = vpop.f32.mrb[41].mxu1 }
 0x4eb   : > { %v2925_v37 = vpop.f32.mrb[42].mxu1  ;;  %v2652_v40 = vpack.c.bf16 %v1785_v36, %v1785_v36 }
 0x4ec   : > { %v2655_v38 = vpack.c.bf16 %v2925_v37, %v2925_v37  ;;  %2191 = vrot.lane.b32.xlu0 %v2654_v35, %s3025_s29  ;;  %v1788_v39 = vpop.f32.mrb[43].mxu1 }
 0x4ed   : > { %v2653_v41 = vpack.c.bf16 %v1788_v39, %v1788_v39 }
 0x4ee   : > { %2193 = vrot.lane.b32.xlu1 %v2655_v38, %s3025_s29 }
 0x4f0   : > { %2187 = vrot.lane.b32.xlu0 %v2652_v40, %s3025_s29 }
 0x4f1   : > { %v2928_v42 = vpop.f32.mrb[44].mxu1 }
 0x4f2   : > { %2189 = vrot.lane.b32.xlu1 %v2653_v41, %s3025_s29  ;;  %v1801_v43 = vpop.f32.mrb[45].mxu1  ;;  %v2658_v61 = vpack.c.bf16 %v2928_v42, %v2928_v42 }
 0x4f3   : > { %v2656_v44 = vpack.c.bf16 %v1801_v43, %v1801_v43  ;;  %v2929_v45 = vpop.f32.mrb[46].mxu1 }
 0x4f4   : > { %v1804_v34 = vpop.f32.mrb[47].mxu1  ;;  %v2659_v62 = vpack.c.bf16 %v2929_v45, %v2929_v45 }
 0x4f5   : > { %v2657_v50 = vpack.c.bf16 %v1804_v34, %v1804_v34  ;;  %2195 = vrot.lane.b32.xlu0 %v2656_v44, %s3025_s29 }
 0x4f7   : > { %2197 = vrot.lane.b32.xlu1 %v2657_v50, %s3025_s29 }
 0x4f9   : > { %2199 = vrot.lane.b32.xlu0 %v2658_v61, %s3025_s29 }
 0x4fb   : > { %2201 = vrot.lane.b32.xlu1 %v2659_v62, %s3025_s29 }
 0x54e   : > { %v2176_v14 = vpop.permute.xlu0 %2175 }
 0x54f   : > { %2222 = vst.msk [vmem:[%s3204_s20 + $0x8] sm:$0xf] %vm2219_vm5, %v2176_v14 }
 0x550   : > { %v2178_v15 = vpop.permute.xlu1 %2177 }
 0x551   : > { %2223 = vst.msk [vmem:[%s3204_s20 + $0xc] sm:$0xf] %vm2219_vm5, %v2178_v15 }
 0x552   : > { %v2172_v30 = vpop.permute.xlu0 %2171 }
 0x553   : > { %2220 = vst.msk [vmem:[%s3204_s20] sm:$0xf] %vm2219_vm5, %v2172_v30 }
 0x554   : > { %v2174_v31 = vpop.permute.xlu1 %2173 }
 0x555   : > { %2221 = vst.msk [vmem:[%s3204_s20 + $0x4] sm:$0xf] %vm2219_vm5, %v2174_v31 }
 0x556   : > { %v2184_v46 = vpop.permute.xlu0 %2183 }
 0x557   : > { %2226 = vst.msk [vmem:[%s3204_s20 + $0x18] sm:$0xf] %vm2219_vm5, %v2184_v46 }
 0x558   : > { %v2186_v48 = vpop.permute.xlu1 %2185 }
 0x559   : > { %2227 = vst.msk [vmem:[%s3204_s20 + $0x1c] sm:$0xf] %vm2219_vm5, %v2186_v48 }
 0x55a   : > { %v2180_v49 = vpop.permute.xlu0 %2179 }
 0x55b   : > { %2224 = vst.msk [vmem:[%s3204_s20 + $0x10] sm:$0xf] %vm2219_vm5, %v2180_v49 }
 0x55c   : > { %v2182_v6 = vpop.permute.xlu1 %2181 }
 0x55d   : > { %2225 = vst.msk [vmem:[%s3204_s20 + $0x14] sm:$0xf] %vm2219_vm5, %v2182_v6 }
 0x55e   : > { %v2192_v51 = vpop.permute.xlu0 %2191 }
 0x55f   : > { %2230 = vst.msk [vmem:[%s3204_s20 + $0x28] sm:$0xf] %vm2219_vm5, %v2192_v51 }
 0x560   : > { %v2194_v52 = vpop.permute.xlu1 %2193 }
 0x561   : > { %2231 = vst.msk [vmem:[%s3204_s20 + $0x2c] sm:$0xf] %vm2219_vm5, %v2194_v52 }
 0x562   : > { %v2188_v3 = vpop.permute.xlu0 %2187 }
 0x563   : > { %2228 = vst.msk [vmem:[%s3204_s20 + $0x20] sm:$0xf] %vm2219_vm5, %v2188_v3 }
 0x564   : > { %v2190_v26 = vpop.permute.xlu1 %2189 }
 0x565   : > { %2229 = vst.msk [vmem:[%s3204_s20 + $0x24] sm:$0xf] %vm2219_vm5, %v2190_v26 }
 0x567   : > { %v2196_v53 = vpop.permute.xlu0 %2195 }
 0x568   : > { %2232 = vst.msk [vmem:[%s3204_s20 + $0x30] sm:$0xf] %vm2219_vm5, %v2196_v53 }
 0x569   : > { %v2198_v54 = vpop.permute.xlu1 %2197 }
 0x56a   : > { %2233 = vst.msk [vmem:[%s3204_s20 + $0x34] sm:$0xf] %vm2219_vm5, %v2198_v54 }
 0x56b   : > { %v2200_v56 = vpop.permute.xlu0 %2199 }
 0x56c   : > { %2234 = vst.msk [vmem:[%s3204_s20 + $0x38] sm:$0xf] %vm2219_vm5, %v2200_v56 }
 0x56d   : > { %v2202_v57 = vpop.permute.xlu1 %2201 }
 0x56e   : > { %2235 = vst.msk [vmem:[%s3204_s20 + $0x3c] sm:$0xf] %vm2219_vm5, %v2202_v57 }
 0x56f PF: > { %s15_s18 = sadd.s32 1, %s3021_s18  }
 0x570   : > { %p12_p4 = scmp.ge.s32.totalorder %s15_s18, 6  }
 0x572   :  { %14 = sbr.rel (!%p12_p4) target bundleno = 1 (0x1), region = 80 }

</bundles_post_ra>
